<compile_context>
chip_gen: v7x
topology: tpu7x:2x2x1
jax: 0.10.0
libtpu: 0.0.40
codegen_flags: <defaults>
</compile_context>

<pallas_src>
import math

import jax
import jax.numpy as jnp
from jax.experimental import pallas as pl
from jax.experimental.pallas import tpu as pltpu


def _mask_irfft_kernel(mix_ref, mask_ref, basis_ref, out_ref):
    # mix_ref:   (1, N, TK)         mixture spectrogram tile (freq, frames)
    # mask_ref:  (1, C, N, TK)      masks for all C sources of this batch tile
    # basis_ref: (n_fft, N)         transposed window-folded inverse-rDFT basis
    # out_ref:   (1, C, n_fft, TK)  windowed time-domain frames (frames on lanes)
    mix = mix_ref[0].astype(jnp.float32)          # loaded once per (m, k-tile)
    basis = basis_ref[...]
    n_sources = mask_ref.shape[1]
    for c in range(n_sources):                    # small static unroll (C ~ 2-4)
        # Multiply in f32 on the VPU (v5e has no bf16 VALU datapath), cast to
        # the MXU dtype only immediately before the matmul.
        spec = (mix * mask_ref[0, c].astype(jnp.float32)).astype(basis.dtype)
        frames = jax.lax.dot_general(             # (n_fft, N) x (N, TK) -> (n_fft, TK)
            basis, spec,
            dimension_numbers=(((1,), (0,)), ((), ())),
            preferred_element_type=jnp.float32,
        )
        out_ref[0, c, :, :] = frames.astype(out_ref.dtype)


def decoder_forward(mixture_w, est_mask, *, L, N, center=True,
                    compute_dtype=jnp.bfloat16):
    """Pallas implementation of Decoder.forward.

    mixture_w: (M, N, K) float32   (one-sided spectrogram, N = n_fft//2 + 1)
    est_mask:  (M, C, N, K) float32
    returns:   (M, C, T) float32 with T = hop*(K-1) when center=True,
               else n_fft + hop*(K-1).
    compute_dtype: jnp.bfloat16 (default; native full-rate MXU dtype, halves
               HBM traffic, ~1e-2 absolute waveform perturbation) or
               jnp.float32 (validation mode).
    """
    mixture_w = jnp.asarray(mixture_w, jnp.float32)
    est_mask = jnp.asarray(est_mask, jnp.float32)

    M, N_in, K = mixture_w.shape
    Mm, C, Nm, Km = est_mask.shape
    assert N_in == N and Nm == N and Mm == M and Km == K

    n_fft = (N - 1) * 2
    hop = L // 2
    win_length = L

    # --- glue: transposed window-folded inverse-rDFT cosine basis ------------
    # torch.istft default window = ones(win_length), zero-padded centered to
    # n_fft; irfft (norm="backward") of a real one-sided spectrum is
    #   x[n] = (1/n_fft) * sum_f c_f * X[f] * cos(2*pi*f*n/n_fft),
    # with c_0 = c_{n_fft/2} = 1, c_f = 2 otherwise.
    window = jnp.ones((win_length,), jnp.float32)
    left = (n_fft - win_length) // 2
    w_pad = jnp.pad(window, (left, n_fft - win_length - left))          # (n_fft,)

    t_idx32 = jnp.arange(n_fft, dtype=jnp.int32)
    f_idx32 = jnp.arange(N, dtype=jnp.int32)
    phase = (t_idx32[:, None] * f_idx32[None, :]) % n_fft               # exact mod
    coef = jnp.full((N,), 2.0, jnp.float32).at[0].set(1.0).at[N - 1].set(1.0)
    basis_t = (w_pad[:, None] * (coef[None, :] / n_fft)
               * jnp.cos((2.0 * math.pi / n_fft) * phase.astype(jnp.float32)))
    basis_t = basis_t.astype(compute_dtype)                             # (n_fft, N)

    # Inputs stream in the compute dtype (bf16 halves HBM reads of the dominant
    # mask + mixture streams; f32 in validation mode).
    mix_in = mixture_w.astype(compute_dtype)
    mask_in = est_mask.astype(compute_dtype)

    # --- Pallas kernel: fused mask multiply + inverse-rDFT matmul ------------
    # Grid: (batch, frame-tiles).  C is folded into the block so mixture_w and
    # the basis stay resident across all sources, and there are fewer, fatter
    # grid steps (0.35 us/step overhead, v7x megacore split).  Frame tile 512
    # (multiple of 128 -> lane-dense blocks); ragged last tile is fine since K
    # is not a reduction axis.
    TK = K if K <= 512 else 512
    num_kt = pl.cdiv(K, TK)
    grid = (M, num_kt)

    itemsize = jnp.dtype(compute_dtype).itemsize
    tile_bytes = (N * TK + C * N * TK + C * n_fft * TK) * itemsize
    basis_bytes = n_fft * N * itemsize
    # Double-buffered streamed tiles + single-buffered basis + headroom,
    # clamped so we never claim more than v7x's 64 MiB physical VMEM.
    vmem_limit = int(min(max(2 * tile_bytes + basis_bytes + (4 << 20), 16 << 20),
                         64 << 20))

    frames_t = pl.pallas_call(
        _mask_irfft_kernel,
        out_shape=jax.ShapeDtypeStruct((M, C, n_fft, K), compute_dtype),
        grid_spec=pltpu.PrefetchScalarGridSpec(
            num_scalar_prefetch=0,
            grid=grid,
            in_specs=[
                pl.BlockSpec((1, N, TK), lambda m, k: (m, 0, k)),
                pl.BlockSpec((1, C, N, TK), lambda m, k: (m, 0, 0, k)),
                # Constant basis: never re-DMA'd, so don't reserve a 2nd buffer.
                pl.BlockSpec((n_fft, N), lambda m, k: (0, 0),
                             pipeline_mode=pl.Buffered(1)),
            ],
            out_specs=pl.BlockSpec((1, C, n_fft, TK),
                                   lambda m, k: (m, 0, 0, k)),
        ),
        compiler_params=pltpu.CompilerParams(
            dimension_semantics=("parallel", "parallel"),
            vmem_limit_bytes=vmem_limit,
        ),
    )(mix_in, mask_in, basis_t)

    # --- glue: overlap-add + window-envelope normalization + center trim -----
    # TODO(synk): overlap-add could be fused into the kernel (hop = n_fft/2
    # couples only adjacent frames; would need per-tile seam carry) — kept in
    # XLA glue for now, with the frames intermediate already halved to bf16.
    frames_f32 = frames_t.astype(jnp.float32)                 # (M, C, n_fft, K)
    full_len = n_fft + hop * (K - 1)
    wsq = w_pad * w_pad

    if n_fft % hop == 0:
        # hop divides n_fft (typical hop = n_fft/2): R shifted adds, no scatter,
        # done directly in the kernel's (time-in-frame, frame) layout.
        R = n_fft // hop
        fr = frames_f32.reshape(M, C, R, hop, K)
        y_seg = jnp.zeros((M, C, hop, K + R - 1), jnp.float32)
        env_seg = jnp.zeros((hop, K + R - 1), jnp.float32)
        wsq_r = wsq.reshape(R, hop)
        for r in range(R):
            y_seg = y_seg.at[:, :, :, r:r + K].add(fr[:, :, r])
            env_seg = env_seg.at[:, r:r + K].add(wsq_r[r][:, None])
        y = jnp.swapaxes(y_seg, -1, -2).reshape(M, C, full_len)
        env = env_seg.T.reshape(full_len)
    else:
        frames_kt = jnp.swapaxes(frames_f32, -1, -2)           # (M, C, K, n_fft)
        t_idx = jnp.arange(K)[:, None] * hop + jnp.arange(n_fft)[None, :]
        y = jnp.zeros((M, C, full_len), jnp.float32).at[:, :, t_idx].add(frames_kt)
        env = jnp.zeros((full_len,), jnp.float32).at[t_idx].add(
            jnp.broadcast_to(wsq, (K, n_fft)))

    if center:
        s = n_fft // 2
        y = y[..., s:full_len - s]
        env = env[s:full_len - s]
    # torch.istft raises when the window envelope is ~zero; it is strictly
    # positive for the default rectangular window with hop = L//2, so divide.
    return y / env


def _reference_decoder(mixture_w, est_mask, *, L, N, center=True):
    """Pure-JAX reference: jnp.fft.irfft frame synthesis + scatter overlap-add."""
    n_fft = (N - 1) * 2
    hop = L // 2
    win_length = L
    M, C, _, K = est_mask.shape
    spec = (mixture_w[:, None] * est_mask).astype(jnp.complex64)       # (M,C,N,K)
    frames = jnp.fft.irfft(jnp.moveaxis(spec, -2, -1), n=n_fft, axis=-1)
    window = jnp.ones((win_length,), jnp.float32)
    left = (n_fft - win_length) // 2
    w = jnp.pad(window, (left, n_fft - win_length - left))
    frames = frames * w
    full_len = n_fft + hop * (K - 1)
    t_idx = jnp.arange(K)[:, None] * hop + jnp.arange(n_fft)[None, :]
    y = jnp.zeros((M, C, full_len), jnp.float32).at[:, :, t_idx].add(frames)
    env = jnp.zeros((full_len,), jnp.float32).at[t_idx].add(
        jnp.broadcast_to(w * w, (K, n_fft)))
    if center:
        s = n_fft // 2
        y = y[..., s:full_len - s]
        env = env[s:full_len - s]
    return y / env


if __name__ == "__main__":
    # Small deterministic example consistent with the module's forward:
    # Decoder(L=16, N=9) -> n_fft=16, hop=8, win=16; spectrogram with K=8 frames.
    L_param, N_param = 16, 9
    M, C, K = 2, 3, 8

    key = jax.random.PRNGKey(0)
    k1, k2 = jax.random.split(key)
    mixture_w = jax.random.normal(k1, (M, N_param, K), dtype=jnp.float32)
    est_mask = jax.nn.sigmoid(
        jax.random.normal(k2, (M, C, N_param, K), dtype=jnp.float32))

    ref = _reference_decoder(mixture_w, est_mask, L=L_param, N=N_param, center=True)
    hop = L_param // 2

    # Fast (default, bf16-streamed) path.
    out = decoder_forward(mixture_w, est_mask, L=L_param, N=N_param, center=True)
    jax.block_until_ready(out)
    assert out.shape == (M, C, hop * (K - 1)), out.shape
    assert out.dtype == jnp.float32
    assert bool(jnp.all(jnp.isfinite(out)))
    assert bool(jnp.allclose(out, ref, atol=5e-2, rtol=5e-2)), (
        float(jnp.max(jnp.abs(out - ref))))

    # f32 validation path (tolerance covers possible bf16-pass MXU rounding of
    # f32 operands on some generations).
    out_f32 = decoder_forward(mixture_w, est_mask, L=L_param, N=N_param,
                              center=True, compute_dtype=jnp.float32)
    jax.block_until_ready(out_f32)
    assert out_f32.shape == (M, C, hop * (K - 1))
    assert bool(jnp.all(jnp.isfinite(out_f32)))
    assert bool(jnp.allclose(out_f32, ref, atol=5e-3, rtol=5e-3)), (
        float(jnp.max(jnp.abs(out_f32 - ref))))

    print("KERNEL_OK")
</pallas_src>

<mosaic_0001>
module attributes {stable_mosaic.version = 11 : i64} {
  func.func @_mask_irfft_kernel(%arg0: i32, %arg1: i32, %arg2: memref<1x9x8xbf16, #tpu.memory_space<vmem>>, %arg3: memref<1x3x9x8xbf16, #tpu.memory_space<vmem>>, %arg4: memref<16x9xbf16, #tpu.memory_space<vmem>>, %arg5: memref<1x3x16x8xbf16, #tpu.memory_space<vmem>>) attributes {dimension_semantics = [#tpu.dimension_semantics<parallel>, #tpu.dimension_semantics<parallel>], iteration_bounds = array<i64: 2, 1>, scalar_prefetch = 0 : i64, scratch_operands = 0 : i64, tpu.core_type = #tpu.core_type<tc>, window_params = [{transform_indices = @transform_0, window_bounds = array<i64: 1, 9, 8>}, {transform_indices = @transform_1, window_bounds = array<i64: 1, 3, 9, 8>}, {pipeline_mode = #tpu.pipeline_mode<synchronous>, transform_indices = @transform_2, window_bounds = array<i64: 16, 9>}, {transform_indices = @transform_3, window_bounds = array<i64: 1, 3, 16, 8>}]} {
    %c0 = arith.constant 0 : index
    %c0_0 = arith.constant 0 : index
    %c0_1 = arith.constant 0 : index
    %0 = vector.load %arg2[%c0, %c0_0, %c0_1] : memref<1x9x8xbf16, #tpu.memory_space<vmem>>, vector<1x9x8xbf16>
    %1 = vector.shape_cast %0 : vector<1x9x8xbf16> to vector<9x8xbf16>
    %2 = arith.extf %1 : vector<9x8xbf16> to vector<9x8xf32>
    %c0_2 = arith.constant 0 : index
    %c0_3 = arith.constant 0 : index
    %3 = vector.load %arg4[%c0_2, %c0_3] : memref<16x9xbf16, #tpu.memory_space<vmem>>, vector<16x9xbf16>
    %c0_4 = arith.constant 0 : index
    %c0_5 = arith.constant 0 : index
    %c0_6 = arith.constant 0 : index
    %c0_7 = arith.constant 0 : index
    %4 = vector.load %arg3[%c0_4, %c0_5, %c0_6, %c0_7] : memref<1x3x9x8xbf16, #tpu.memory_space<vmem>>, vector<1x1x9x8xbf16>
    %5 = vector.shape_cast %4 : vector<1x1x9x8xbf16> to vector<9x8xbf16>
    %6 = arith.extf %5 : vector<9x8xbf16> to vector<9x8xf32>
    %7 = arith.mulf %2, %6 : vector<9x8xf32>
    %8 = arith.truncf %7 : vector<9x8xf32> to vector<9x8xbf16>
    %cst = arith.constant dense<0.000000e+00> : vector<16x8xf32>
    %9 = tpu.matmul %3, %8, %cst {dimension_numbers = #tpu.dot_dimension_numbers<[1], [0], [0], [1], [0, 0, 1, 1], [], []>} : vector<16x9xbf16>, vector<9x8xbf16>, vector<16x8xf32> -> vector<16x8xf32>
    %10 = arith.truncf %9 : vector<16x8xf32> to vector<16x8xbf16>
    %c0_8 = arith.constant 0 : index
    %c0_9 = arith.constant 0 : index
    %c0_10 = arith.constant 0 : index
    %c0_11 = arith.constant 0 : index
    %11 = vector.load %arg5[%c0_8, %c0_9, %c0_10, %c0_11] : memref<1x3x16x8xbf16, #tpu.memory_space<vmem>>, vector<1x1x16x8xbf16>
    %12 = vector.shape_cast %11 : vector<1x1x16x8xbf16> to vector<16x8xbf16>
    %13 = vector.shape_cast %10 : vector<16x8xbf16> to vector<1x1x16x8xbf16>
    tpu.vector_store %arg5[%c0_8, %c0_9, %c0_10, %c0_11], %13 {strides = array<i32>} : memref<1x3x16x8xbf16, #tpu.memory_space<vmem>>, vector<1x1x16x8xbf16>,
    %c0_12 = arith.constant 0 : index
    %c1 = arith.constant 1 : index
    %c0_13 = arith.constant 0 : index
    %c0_14 = arith.constant 0 : index
    %14 = vector.load %arg3[%c0_12, %c1, %c0_13, %c0_14] : memref<1x3x9x8xbf16, #tpu.memory_space<vmem>>, vector<1x1x9x8xbf16>
    %15 = vector.shape_cast %14 : vector<1x1x9x8xbf16> to vector<9x8xbf16>
    %16 = arith.extf %15 : vector<9x8xbf16> to vector<9x8xf32>
    %17 = arith.mulf %2, %16 : vector<9x8xf32>
    %18 = arith.truncf %17 : vector<9x8xf32> to vector<9x8xbf16>
    %cst_15 = arith.constant dense<0.000000e+00> : vector<16x8xf32>
    %19 = tpu.matmul %3, %18, %cst_15 {dimension_numbers = #tpu.dot_dimension_numbers<[1], [0], [0], [1], [0, 0, 1, 1], [], []>} : vector<16x9xbf16>, vector<9x8xbf16>, vector<16x8xf32> -> vector<16x8xf32>
    %20 = arith.truncf %19 : vector<16x8xf32> to vector<16x8xbf16>
    %c0_16 = arith.constant 0 : index
    %c1_17 = arith.constant 1 : index
    %c0_18 = arith.constant 0 : index
    %c0_19 = arith.constant 0 : index
    %21 = vector.load %arg5[%c0_16, %c1_17, %c0_18, %c0_19] : memref<1x3x16x8xbf16, #tpu.memory_space<vmem>>, vector<1x1x16x8xbf16>
    %22 = vector.shape_cast %21 : vector<1x1x16x8xbf16> to vector<16x8xbf16>
    %23 = vector.shape_cast %20 : vector<16x8xbf16> to vector<1x1x16x8xbf16>
    tpu.vector_store %arg5[%c0_16, %c1_17, %c0_18, %c0_19], %23 {strides = array<i32>} : memref<1x3x16x8xbf16, #tpu.memory_space<vmem>>, vector<1x1x16x8xbf16>,
    %c0_20 = arith.constant 0 : index
    %c2 = arith.constant 2 : index
    %c0_21 = arith.constant 0 : index
    %c0_22 = arith.constant 0 : index
    %24 = vector.load %arg3[%c0_20, %c2, %c0_21, %c0_22] : memref<1x3x9x8xbf16, #tpu.memory_space<vmem>>, vector<1x1x9x8xbf16>
    %25 = vector.shape_cast %24 : vector<1x1x9x8xbf16> to vector<9x8xbf16>
    %26 = arith.extf %25 : vector<9x8xbf16> to vector<9x8xf32>
    %27 = arith.mulf %2, %26 : vector<9x8xf32>
    %28 = arith.truncf %27 : vector<9x8xf32> to vector<9x8xbf16>
    %cst_23 = arith.constant dense<0.000000e+00> : vector<16x8xf32>
    %29 = tpu.matmul %3, %28, %cst_23 {dimension_numbers = #tpu.dot_dimension_numbers<[1], [0], [0], [1], [0, 0, 1, 1], [], []>} : vector<16x9xbf16>, vector<9x8xbf16>, vector<16x8xf32> -> vector<16x8xf32>
    %30 = arith.truncf %29 : vector<16x8xf32> to vector<16x8xbf16>
    %c0_24 = arith.constant 0 : index
    %c2_25 = arith.constant 2 : index
    %c0_26 = arith.constant 0 : index
    %c0_27 = arith.constant 0 : index
    %31 = vector.load %arg5[%c0_24, %c2_25, %c0_26, %c0_27] : memref<1x3x16x8xbf16, #tpu.memory_space<vmem>>, vector<1x1x16x8xbf16>
    %32 = vector.shape_cast %31 : vector<1x1x16x8xbf16> to vector<16x8xbf16>
    %33 = vector.shape_cast %30 : vector<16x8xbf16> to vector<1x1x16x8xbf16>
    tpu.vector_store %arg5[%c0_24, %c2_25, %c0_26, %c0_27], %33 {strides = array<i32>} : memref<1x3x16x8xbf16, #tpu.memory_space<vmem>>, vector<1x1x16x8xbf16>,
    return
  }
  func.func @transform_0(%arg0: i32, %arg1: i32) -> (i32, i32, i32) {
    %c0_i32 = arith.constant 0 : i32
    %c0_i32_0 = arith.constant 0 : i32
    return %arg0, %c0_i32, %arg1 : i32, i32, i32
  }
  func.func @transform_1(%arg0: i32, %arg1: i32) -> (i32, i32, i32, i32) {
    %c0_i32 = arith.constant 0 : i32
    %c0_i32_0 = arith.constant 0 : i32
    %c0_i32_1 = arith.constant 0 : i32
    return %arg0, %c0_i32, %c0_i32_0, %arg1 : i32, i32, i32, i32
  }
  func.func @transform_2(%arg0: i32, %arg1: i32) -> (i32, i32) {
    %c0_i32 = arith.constant 0 : i32
    %c0_i32_0 = arith.constant 0 : i32
    %c0_i32_1 = arith.constant 0 : i32
    return %c0_i32, %c0_i32_0 : i32, i32
  }
  func.func @transform_3(%arg0: i32, %arg1: i32) -> (i32, i32, i32, i32) {
    %c0_i32 = arith.constant 0 : i32
    %c0_i32_0 = arith.constant 0 : i32
    %c0_i32_1 = arith.constant 0 : i32
    return %arg0, %c0_i32, %c0_i32_0, %arg1 : i32, i32, i32, i32
  }
}

</mosaic_0001>

<bundles_post_ra>
// kernel: tpu_custom_call.1
= control target key start
LH: loop header
LB: loop body
LE: loop exit
PB: predicated region body
PF: predicated region fallthrough
CT: control target
= control target key end

     0   :  { %s678_s12 = smov 0   ;;  %s680_s13 = smov 0   ;;  %s735_s0 = inlined_call_operand.vmem [shape: bf16[2,9,8], index: 0, kind: input, shape index: {}]   ;;  %s736_s1 = inlined_call_operand.vmem [shape: bf16[2,3,9,8], index: 1, kind: input, shape index: {}]   ;;  %s737_s2 = inlined_call_operand.vmem [shape: bf16[16,9], index: 2, kind: input, shape index: {}]   ;;  %s738_s3 = inlined_call_operand.vmem [shape: bf16[2,3,16,8], index: 3, kind: output, shape index: {}]  }
   0x1   :  { %s682_s14 = smov 0  }
   0x2 LB: > { %s25_s15 = sadd.s32 1, %s649_s13  ;;  %p546_p0 = scmp.ge.s32.totalorder %s653_s14, 1  ;;  %s653_s14 = sphi %s682_s14, %s13_s14   ;;  %s649_s13 = sphi %s680_s13, %s740_s13   ;;  %s645_s12 = sphi %s678_s12, %s739_s12  }
   0x3   : > { %p27_p1 = scmp.ge.s32.totalorder %s25_s15, 2  ;;  %p171_p2 = scmp.lt.s32.totalorder %s653_s14, 3 }
   0x5   : > { %s742_s15 = smov (%p27_p1, %s25_s15), 0  ;;  %p172_p3 = pnand %p546_p0, %p171_p2 }
   0x6   : > { %p209_p4 = scmp.lt.s32.totalorder (!%p172_p3), %s645_s12, 1  ;;  %v655_v0 = vmov (!%p172_p3), 0.0   ;;  %vm656_vm0 = vmmov (!%p172_p3), 0   ;;  %vm256_vm1 = vcmask (!%p172_p3), 1043456   ;;  %vm257_vm2 = vcmask (!%p172_p3), 1044480   ;;  %v630_v29 = vld [vmem:[%s737_s2] sm:$0xff] (!%p172_p3)  }
   0x7   : > { %175 = sbr.rel (%p172_p3) target bundleno = 255 (0xff), region = 32  ;;  %584 = vmatprep.subr.bf16.mxu0 (!%p172_p3), %v655_v0  ;;  %590 = vmatprep.subr.bf16.mxu1 (!%p172_p3), %v655_v0  ;;  %v657_v3 = vmov (!%p172_p3), 65535   ;;  %vm252_vm3 = vcmask (!%p172_p3), 72704   ;;  %vm312_vm4 = vcmask (!%p172_p3), 60416  }
   0x8   : > { %586 = vmatprep.mubr.msk.bf16.mxu0 (!%p172_p3), %vm656_vm0, %v655_v0  ;;  %592 = vmatprep.mubr.msk.bf16.mxu1 (!%p172_p3), %vm656_vm0, %v655_v0  ;;  %v258_v4 = vsel (!%p172_p3), %vm256_vm1, 4294967295, %v657_v3 }
   0x9   : > { %v259_v22 = vsel (!%p172_p3), %vm257_vm2, %v258_v4, 0 }
   0xe   : > { %s744_s12 = smov (!%p209_p4, %s645_s12), 1 }
   0xf   : > { %s571_s16 = sshll.u32 %s744_s12, 3  ;;  %s602_s17 = smul.u32 24, %s744_s12 }
  0x10   : > { %s216_s20 = scalar_lea.vmem %s735_s0, %s571_s16 }
  0x11   : > { %s224_s23 = scalar_lea.vmem %s736_s1, %s602_s17  ;;  %v234_v1 = vld [vmem:[%s216_s20] sm:$0xf]  ;;  %v235_v2 = vld [vmem:[%s216_s20 + $0x4] sm:$0x1]  ;;  %s232_s28 = scalar_lea.vmem %s738_s3, %s602_s17 }
  0x12   : > { %v236_v5 = vunpack.c.l.bf16 %v234_v1  ;;  %v237_v6 = vunpack.c.l.bf16 %v235_v2  ;;  %v240_v7 = vld [vmem:[%s224_s23] ss:$16 sps:$4 sm:$0xff]   ;;  %v241_v8 = vld [vmem:[%s224_s23 + $0x4] sm:$0x1]  ;;  %v563_v9 = vld [vmem:[%s224_s23 + $0x14] sm:$0x1] }
  0x13   : > { %v242_v10 = vunpack.c.l.bf16 %v240_v7  ;;  %v243_v11 = vunpack.c.l.bf16 %v241_v8  ;;  %v381_v12 = vunpack.c.h.bf16 %v240_v7  ;;  %v382_v13 = vunpack.c.l.bf16 %v563_v9  ;;  %v555_v14 = vld [vmem:[%s224_s23 + $0x8] sm:$0xf]  ;;  %v556_v15 = vld [vmem:[%s224_s23 + $0xc] sm:$0x1] }
  0x14   : > { %v318_v16 = vunpack.c.l.bf16 %v555_v14  ;;  %v319_v17 = vunpack.c.l.bf16 %v556_v15 }
  0x15   : > { %v244_v18 = vmul.f32 %v242_v10, %v236_v5  ;;  %v245_v19 = vmul.f32 %v243_v11, %v237_v6  ;;  %v383_v20 = vmul.f32 %v381_v12, %v236_v5  ;;  %v384_v21 = vmul.f32 %v382_v13, %v237_v6 }
  0x16   : > { %v320_v23 = vmul.f32 %v318_v16, %v236_v5  ;;  %v321_v24 = vmul.f32 %v319_v17, %v237_v6 }
  0x17   : > { %v246_v25 = vpack.c.bf16 %v245_v19, %v244_v18  ;;  %v385_v26 = vpack.c.bf16 %v384_v21, %v383_v20 }
  0x18   : > { %v322_v27 = vpack.c.bf16 %v321_v24, %v320_v23 }
  0x19   : > { %v261_v28 = vand.u32 %v259_v22, %v246_v25  ;;  %v387_v31 = vand.u32 %v385_v26, %v259_v22 }
  0x1a   : > { %v324_v30 = vand.u32 %v322_v27, %v259_v22 }
  0x1b   : > { %585 = vmatpush3.bf16.msra.mxu0 %v261_v28 }
  0x1c   : > { %596 = vmatprep.subr.bf16.mxu0 %v655_v0  ;;  %591 = vmatpush3.bf16.msra.mxu1 %v324_v30 }
  0x1e   : > { %587 = vmatmul.mubr.msk.bf16.vlgmr.msra.gmra.mrb[0].mxu0 %vm252_vm3, %v630_v29 }
  0x1f   : > { %597 = vmatpush3.bf16.msra.mxu0 %v387_v31  ;;  %593 = vmatmul.mubr.msk.bf16.vlgmr.msra.gmra.mrb[0].mxu1 %vm252_vm3, %v630_v29 }
  0x20   : > { %598 = vmatprep.mubr.msk.bf16.mxu0 %vm656_vm0, %v655_v0 }
  0x26   : > { %599 = vmatmul.mubr.msk.bf16.vlgmr.msra.gmra.mrb[4].mxu0 %vm252_vm3, %v630_v29 }
  0xf1   : > { %v297_v32 = vpop.f32.mrb[0].mxu0 }
  0xf2   : > { %v572_v33 = vpack.c.bf16 %v297_v32, %v297_v32  ;;  %v588_v34 = vpop.f32.mrb[1].mxu0  ;;  %v360_v35 = vpop.f32.mrb[0].mxu1 }
  0xf3   : > { %v300_v36 = vpop.f32.mrb[2].mxu0  ;;  %v574_v37 = vpack.c.bf16 %v360_v35, %v360_v35  ;;  %v594_v38 = vpop.f32.mrb[1].mxu1 }
  0xf4   : > { %313 = vst.msk [vmem:[%s232_s28] sm:$0xf] %vm312_vm4, %v572_v33  ;;  %v573_v39 = vpack.c.bf16 %v300_v36, %v300_v36  ;;  %v589_v40 = vpop.f32.mrb[3].mxu0  ;;  %v363_v41 = vpop.f32.mrb[2].mxu1 }
  0xf5   : > { %560 = vst.msk [vmem:[%s232_s28 + $0x8] sm:$0xf] %vm312_vm4, %v574_v37  ;;  %v575_v42 = vpack.c.bf16 %v363_v41, %v363_v41  ;;  %v595_v43 = vpop.f32.mrb[3].mxu1 }
  0xf6   : > { %314 = vst.msk [vmem:[%s232_s28 + $0x4] sm:$0xf] %vm312_vm4, %v573_v39 }
  0xf7   : > { %561 = vst.msk [vmem:[%s232_s28 + $0xc] sm:$0xf] %vm312_vm4, %v575_v42 }
  0xf9   : > { %v423_v44 = vpop.f32.mrb[4].mxu0 }
  0xfa   : > { %v576_v45 = vpack.c.bf16 %v423_v44, %v423_v44  ;;  %v600_v46 = vpop.f32.mrb[5].mxu0 }
  0xfb   : > { %v426_v47 = vpop.f32.mrb[6].mxu0 }
  0xfc   : > { %567 = vst.msk [vmem:[%s232_s28 + $0x10] sm:$0xf] %vm312_vm4, %v576_v45  ;;  %v577_v48 = vpack.c.bf16 %v426_v47, %v426_v47  ;;  %v601_v49 = vpop.f32.mrb[7].mxu0 }
  0xfe   : > { %568 = vst.msk [vmem:[%s232_s28 + $0x14] sm:$0xf] %vm312_vm4, %v577_v48 }
  0xff PF: > { %s13_s14 = sadd.s32 1, %s653_s14   ;;  %s739_s12 = smov %s649_s13 }
 0x100   : > { %p10_p5 = scmp.ge.s32.totalorder %s13_s14, 4   ;;  %s740_s13 = smov %s742_s15 }
 0x102   :  { %12 = sbr.rel (!%p10_p5) target bundleno = 2 (0x2), region = 69 }

</bundles_post_ra>
